<compile_context>
chip_gen: v7x
topology: tpu7x:2x2x1
jax: 0.10.0
libtpu: 0.0.40
codegen_flags: <defaults>
</compile_context>

<pallas_src>
import jax
import jax.numpy as jnp
from jax import lax
from jax.experimental import pallas as pl
from jax.experimental.pallas import tpu as pltpu


def _net5_kernel(at_ref, inv_ref, x0_ref, wl_ref, wc_ref, b_ref, out_ref, xt_ref):
    """One (layer, node-column-block) grid step, feature-major.

    at_ref  : [Np, tn]  bf16  column block j of A^T (integer in-edge counts)
    inv_ref : [1,  tn]  f32   1/deg for the destination nodes of this block
    x0_ref  : [F,  Np]  f32   input features, transposed (resident, DMA'd once)
    wl_ref  : [1, F, F] f32   SAGE neighbour weight W_l (PyTorch [out, in])
    wc_ref  : [1, F, F] f32   fused root+linear weight W_r + W_lin
    b_ref   : [1, F, 1] f32   fused bias b_l + b_lin
    out_ref : [F,  tn]  f32   column block j of the final x^T
    xt_ref  : [2F, Np]  f32   persistent ping-pong activation scratch
    """
    layer = pl.program_id(0)
    j = pl.program_id(1)
    f = out_ref.shape[0]
    tn = out_ref.shape[1]

    # Seed the ping-pong scratch with the input features, once.
    @pl.when(jnp.logical_and(layer == 0, j == 0))
    def _():
        xt_ref[pl.ds(0, f), :] = x0_ref[...]

    r_off = pl.multiple_of(lax.rem(layer, 2) * f, 8)       # read-slot row offset
    w_off = pl.multiple_of(lax.rem(layer + 1, 2) * f, 8)   # write-slot row offset
    col = pl.multiple_of(j * tn, 128)

    x_full = xt_ref[pl.ds(r_off, f), :]                    # [F, Np] layer input
    x_blk = xt_ref[pl.ds(r_off, f), pl.ds(col, tn)]        # [F, tn] root block

    # Mean aggregation: agg^T = (x^T @ A^T) * (1/deg); normalization stays f32.
    a_blk = at_ref[...].astype(jnp.float32)                # [Np, tn]
    agg_t = jnp.dot(x_full, a_blk, preferred_element_type=jnp.float32)  # [F, tn]
    agg_t = agg_t * inv_ref[...]                            # lane-wise scale

    # x_new^T = W_l @ agg^T + (W_r + W_lin) @ x^T + (b_l + b_lin)
    out_t = (jnp.dot(wl_ref[0], agg_t, preferred_element_type=jnp.float32)
             + jnp.dot(wc_ref[0], x_blk, preferred_element_type=jnp.float32)
             + b_ref[0])

    xt_ref[pl.ds(w_off, f), pl.ds(col, tn)] = out_t         # next layer's input
    out_ref[...] = out_t                                     # last layer wins in HBM


def _round_up(x, m):
    return -(-x // m) * m


@jax.jit
def net5_forward(x, a_counts, inv_deg, w_l, w_r, w_lin, b_l, b_lin):
    """x: [N, F] f32; a_counts: [N, N] in-edge counts (a[i, j] = #edges j->i);
    inv_deg: [N] f32; weights in PyTorch [L, F_out, F_in] layout; biases [L, F]."""
    n, f = x.shape
    num_layers = w_l.shape[0]
    assert w_l.shape == (num_layers, f, f) and f % 8 == 0

    # ---- layout plumbing (feature-major, lane-dense), done once in the wrapper
    n_pad = _round_up(n, 128)
    tn = 512 if n_pad % 512 == 0 else (256 if n_pad % 256 == 0 else 128)
    num_blocks = n_pad // tn

    xt = jnp.pad(x, ((0, n_pad - n), (0, 0))).T                          # [F, Np]
    at = jnp.pad(a_counts, ((0, n_pad - n), (0, n_pad - n))).T           # [Np, Np]
    at = at.astype(jnp.bfloat16)            # small integer counts: exact in bf16
    inv = jnp.pad(inv_deg, (0, n_pad - n)).reshape(1, n_pad)             # [1, Np]

    w_c = w_r + w_lin                                                    # exact fusion
    b = (b_l + b_lin).reshape(num_layers, f, 1)                          # [L, F, 1]

    # ---- explicit VMEM budget: double-buffered streamed tiles + residents
    vmem_needed = (
        2 * n_pad * tn * 2          # A^T bf16 blocks (2 buffers)
        + 2 * tn * 4                # inv-degree blocks
        + 2 * f * n_pad * 4         # x0^T
        + 2 * f * n_pad * 4         # ping-pong activation scratch
        + 2 * f * tn * 4            # output blocks
        + 4 * num_layers * f * f * 4 + 2 * num_layers * f * 4  # weights/bias
    )
    vmem_limit = max(int(vmem_needed * 1.25) + (2 << 20), 32 << 20)

    grid_spec = pltpu.PrefetchScalarGridSpec(
        num_scalar_prefetch=0,
        grid=(num_layers, num_blocks),
        in_specs=[
            pl.BlockSpec((n_pad, tn), lambda l, j: (0, j)),      # A^T column block
            pl.BlockSpec((1, tn), lambda l, j: (0, j)),          # 1/deg block
            pl.BlockSpec((f, n_pad), lambda l, j: (0, 0)),       # x0^T (resident)
            pl.BlockSpec((1, f, f), lambda l, j: (l, 0, 0)),     # W_l
            pl.BlockSpec((1, f, f), lambda l, j: (l, 0, 0)),     # W_r + W_lin
            pl.BlockSpec((1, f, 1), lambda l, j: (l, 0, 0)),     # b_l + b_lin
        ],
        out_specs=pl.BlockSpec((f, tn), lambda l, j: (0, j)),
        scratch_shapes=[pltpu.VMEM((2 * f, n_pad), jnp.float32)],
    )

    out_t = pl.pallas_call(
        _net5_kernel,
        out_shape=jax.ShapeDtypeStruct((f, n_pad), jnp.float32),
        grid_spec=grid_spec,
        compiler_params=pltpu.CompilerParams(
            dimension_semantics=("arbitrary", "arbitrary"),
            vmem_limit_bytes=vmem_limit,
        ),
    )(at, inv, xt, w_l, w_c, b)

    return out_t.T[:n]


def build_adjacency(edge_index, num_nodes):
    """Dense in-edge count matrix a[i, j] = #edges (j -> i), plus f32 1/in-degree."""
    src, dst = edge_index[0], edge_index[1]
    a = jnp.zeros((num_nodes, num_nodes), jnp.float32).at[dst, src].add(1.0)
    deg = a.sum(axis=1)
    inv_deg = jnp.where(deg > 0, 1.0 / jnp.maximum(deg, 1.0), 0.0)
    return a, inv_deg


def reference_forward(x, a_counts, inv_deg, w_l, w_r, w_lin, b_l, b_lin):
    """Unfused plain-JAX reference matching the PyTorch Net5 forward."""
    for l in range(w_l.shape[0]):
        agg = (a_counts @ x) * inv_deg[:, None]               # scatter-mean
        x = agg @ w_l[l].T + b_l[l] + x @ w_r[l].T + x @ w_lin[l].T + b_lin[l]
    return x


if __name__ == "__main__":
    num_layers = 3
    N, F, E = 384, 16, 1536

    key = jax.random.PRNGKey(0)
    keys = jax.random.split(key, 8)

    # Node features and a small random graph.
    x = jax.random.normal(keys[0], (N, F), jnp.float32)
    src = jax.random.randint(keys[1], (E,), 0, N)
    dst = jax.random.randint(keys[2], (E,), 0, N)
    edge_index = jnp.stack([src, dst], axis=0)    # [2, E], row0=src, row1=dst

    # PyTorch-like uniform(-1/sqrt(F), 1/sqrt(F)) init, [L, F_out, F_in] layout.
    bound = 1.0 / (F ** 0.5)
    w_l = jax.random.uniform(keys[3], (num_layers, F, F), jnp.float32, -bound, bound)
    w_r = jax.random.uniform(keys[4], (num_layers, F, F), jnp.float32, -bound, bound)
    w_lin = jax.random.uniform(keys[5], (num_layers, F, F), jnp.float32, -bound, bound)
    b_l = jax.random.uniform(keys[6], (num_layers, F), jnp.float32, -bound, bound)
    b_lin = jax.random.uniform(keys[7], (num_layers, F), jnp.float32, -bound, bound)

    a_counts, inv_deg = build_adjacency(edge_index, N)

    out = net5_forward(x, a_counts, inv_deg, w_l, w_r, w_lin, b_l, b_lin)
    out = jax.block_until_ready(out)

    ref = reference_forward(x, a_counts, inv_deg, w_l, w_r, w_lin, b_l, b_lin)
    assert out.shape == (N, F)
    assert jnp.allclose(out, ref, atol=1e-4, rtol=1e-4), "mismatch vs reference"

    print("KERNEL_OK")
</pallas_src>

<mosaic_0001>
module attributes {stable_mosaic.version = 11 : i64} {
  func.func @_net5_kernel(%arg0: i32, %arg1: i32, %arg2: memref<384x128xbf16, #tpu.memory_space<vmem>>, %arg3: memref<1x128xf32, #tpu.memory_space<vmem>>, %arg4: memref<16x384xf32, #tpu.memory_space<vmem>>, %arg5: memref<1x16x16xf32, #tpu.memory_space<vmem>>, %arg6: memref<1x16x16xf32, #tpu.memory_space<vmem>>, %arg7: memref<1x16x1xf32, #tpu.memory_space<vmem>>, %arg8: memref<16x128xf32, #tpu.memory_space<vmem>>, %arg9: memref<32x384xf32, #tpu.memory_space<vmem>>) attributes {dimension_semantics = [#tpu.dimension_semantics<arbitrary>, #tpu.dimension_semantics<arbitrary>], iteration_bounds = array<i64: 3, 3>, scalar_prefetch = 0 : i64, scratch_operands = 1 : i64, tpu.core_type = #tpu.core_type<tc>, window_params = [{transform_indices = @transform_0, window_bounds = array<i64: 384, 128>}, {transform_indices = @transform_1, window_bounds = array<i64: 1, 128>}, {pipeline_mode = #tpu.pipeline_mode<synchronous>, transform_indices = @transform_2, window_bounds = array<i64: 16, 384>}, {transform_indices = @transform_3, window_bounds = array<i64: 1, 16, 16>}, {transform_indices = @transform_4, window_bounds = array<i64: 1, 16, 16>}, {transform_indices = @transform_5, window_bounds = array<i64: 1, 16, 1>}, {transform_indices = @transform_6, window_bounds = array<i64: 16, 128>}]} {
    %c0_i32 = arith.constant 0 : i32
    %0 = arith.cmpi eq, %arg0, %c0_i32 : i32
    %c0_i32_0 = arith.constant 0 : i32
    %1 = arith.cmpi eq, %arg1, %c0_i32_0 : i32
    %2 = arith.andi %0, %1 : i1
    %3 = arith.extui %2 : i1 to i32
    %c0_i32_1 = arith.constant 0 : i32
    %4 = arith.cmpi ne, %3, %c0_i32_1 : i32
    scf.if %4 {
      %c0_21 = arith.constant 0 : index
      %c0_22 = arith.constant 0 : index
      %40 = vector.load %arg4[%c0_21, %c0_22] : memref<16x384xf32, #tpu.memory_space<vmem>>, vector<16x384xf32>
      %c0_23 = arith.constant 0 : index
      %c0_24 = arith.constant 0 : index
      %41 = vector.load %arg9[%c0_23, %c0_24] : memref<32x384xf32, #tpu.memory_space<vmem>>, vector<16x384xf32>
      tpu.vector_store %arg9[%c0_23, %c0_24], %40 {strides = array<i32>} : memref<32x384xf32, #tpu.memory_space<vmem>>, vector<16x384xf32>,
    } else {
    }
    %c2_i32 = arith.constant 2 : i32
    %5 = arith.remsi %arg0, %c2_i32 : i32
    %c16_i32 = arith.constant 16 : i32
    %6 = arith.muli %5, %c16_i32 : i32
    %7 = tpu.assume_multiple %6, 8 : i32
    %c1_i32 = arith.constant 1 : i32
    %8 = arith.addi %arg0, %c1_i32 : i32
    %c2_i32_2 = arith.constant 2 : i32
    %9 = arith.remsi %8, %c2_i32_2 : i32
    %c16_i32_3 = arith.constant 16 : i32
    %10 = arith.muli %9, %c16_i32_3 : i32
    %11 = tpu.assume_multiple %10, 8 : i32
    %c128_i32 = arith.constant 128 : i32
    %12 = arith.muli %arg1, %c128_i32 : i32
    %13 = tpu.assume_multiple %12, 128 : i32
    %14 = arith.index_cast %7 : i32 to index
    %c0 = arith.constant 0 : index
    %15 = vector.load %arg9[%14, %c0] : memref<32x384xf32, #tpu.memory_space<vmem>>, vector<16x384xf32>
    %16 = arith.index_cast %7 : i32 to index
    %17 = arith.index_cast %13 : i32 to index
    %18 = vector.load %arg9[%16, %17] : memref<32x384xf32, #tpu.memory_space<vmem>>, vector<16x128xf32>
    %c0_4 = arith.constant 0 : index
    %c0_5 = arith.constant 0 : index
    %19 = vector.load %arg2[%c0_4, %c0_5] : memref<384x128xbf16, #tpu.memory_space<vmem>>, vector<384x128xbf16>
    %20 = arith.extf %19 : vector<384x128xbf16> to vector<384x128xf32>
    %cst = arith.constant dense<0.000000e+00> : vector<16x128xf32>
    %21 = tpu.matmul %15, %20, %cst {dimension_numbers = #tpu.dot_dimension_numbers<[1], [0], [0], [1], [0, 0, 1, 1], [], []>} : vector<16x384xf32>, vector<384x128xf32>, vector<16x128xf32> -> vector<16x128xf32>
    %c0_6 = arith.constant 0 : index
    %c0_7 = arith.constant 0 : index
    %22 = vector.load %arg3[%c0_6, %c0_7] : memref<1x128xf32, #tpu.memory_space<vmem>>, vector<1x128xf32>
    %23 = vector.broadcast %22 : vector<1x128xf32> to vector<16x128xf32>
    %24 = arith.mulf %21, %23 : vector<16x128xf32>
    %c0_8 = arith.constant 0 : index
    %c0_9 = arith.constant 0 : index
    %c0_10 = arith.constant 0 : index
    %25 = vector.load %arg5[%c0_8, %c0_9, %c0_10] : memref<1x16x16xf32, #tpu.memory_space<vmem>>, vector<1x16x16xf32>
    %26 = vector.shape_cast %25 : vector<1x16x16xf32> to vector<16x16xf32>
    %cst_11 = arith.constant dense<0.000000e+00> : vector<16x128xf32>
    %27 = tpu.matmul %26, %24, %cst_11 {dimension_numbers = #tpu.dot_dimension_numbers<[1], [0], [0], [1], [0, 0, 1, 1], [], []>} : vector<16x16xf32>, vector<16x128xf32>, vector<16x128xf32> -> vector<16x128xf32>
    %c0_12 = arith.constant 0 : index
    %c0_13 = arith.constant 0 : index
    %c0_14 = arith.constant 0 : index
    %28 = vector.load %arg6[%c0_12, %c0_13, %c0_14] : memref<1x16x16xf32, #tpu.memory_space<vmem>>, vector<1x16x16xf32>
    %29 = vector.shape_cast %28 : vector<1x16x16xf32> to vector<16x16xf32>
    %cst_15 = arith.constant dense<0.000000e+00> : vector<16x128xf32>
    %30 = tpu.matmul %29, %18, %cst_15 {dimension_numbers = #tpu.dot_dimension_numbers<[1], [0], [0], [1], [0, 0, 1, 1], [], []>} : vector<16x16xf32>, vector<16x128xf32>, vector<16x128xf32> -> vector<16x128xf32>
    %31 = arith.addf %27, %30 : vector<16x128xf32>
    %c0_16 = arith.constant 0 : index
    %c0_17 = arith.constant 0 : index
    %c0_18 = arith.constant 0 : index
    %32 = vector.load %arg7[%c0_16, %c0_17, %c0_18] : memref<1x16x1xf32, #tpu.memory_space<vmem>>, vector<1x16x1xf32>
    %33 = vector.shape_cast %32 : vector<1x16x1xf32> to vector<16x1xf32>
    %34 = vector.broadcast %33 : vector<16x1xf32> to vector<16x128xf32>
    %35 = arith.addf %31, %34 : vector<16x128xf32>
    %36 = arith.index_cast %11 : i32 to index
    %37 = arith.index_cast %13 : i32 to index
    %38 = vector.load %arg9[%36, %37] : memref<32x384xf32, #tpu.memory_space<vmem>>, vector<16x128xf32>
    tpu.vector_store %arg9[%36, %37], %35 {strides = array<i32>} : memref<32x384xf32, #tpu.memory_space<vmem>>, vector<16x128xf32>,
    %c0_19 = arith.constant 0 : index
    %c0_20 = arith.constant 0 : index
    %39 = vector.load %arg8[%c0_19, %c0_20] : memref<16x128xf32, #tpu.memory_space<vmem>>, vector<16x128xf32>
    tpu.vector_store %arg8[%c0_19, %c0_20], %35 {strides = array<i32>} : memref<16x128xf32, #tpu.memory_space<vmem>>, vector<16x128xf32>,
    return
  }
  func.func @transform_0(%arg0: i32, %arg1: i32) -> (i32, i32) {
    %c0_i32 = arith.constant 0 : i32
    %c0_i32_0 = arith.constant 0 : i32
    return %c0_i32, %arg1 : i32, i32
  }
  func.func @transform_1(%arg0: i32, %arg1: i32) -> (i32, i32) {
    %c0_i32 = arith.constant 0 : i32
    %c0_i32_0 = arith.constant 0 : i32
    return %c0_i32, %arg1 : i32, i32
  }
  func.func @transform_2(%arg0: i32, %arg1: i32) -> (i32, i32) {
    %c0_i32 = arith.constant 0 : i32
    %c0_i32_0 = arith.constant 0 : i32
    %c0_i32_1 = arith.constant 0 : i32
    return %c0_i32, %c0_i32_0 : i32, i32
  }
  func.func @transform_3(%arg0: i32, %arg1: i32) -> (i32, i32, i32) {
    %c0_i32 = arith.constant 0 : i32
    %c0_i32_0 = arith.constant 0 : i32
    %c0_i32_1 = arith.constant 0 : i32
    return %arg0, %c0_i32, %c0_i32_0 : i32, i32, i32
  }
  func.func @transform_4(%arg0: i32, %arg1: i32) -> (i32, i32, i32) {
    %c0_i32 = arith.constant 0 : i32
    %c0_i32_0 = arith.constant 0 : i32
    %c0_i32_1 = arith.constant 0 : i32
    return %arg0, %c0_i32, %c0_i32_0 : i32, i32, i32
  }
  func.func @transform_5(%arg0: i32, %arg1: i32) -> (i32, i32, i32) {
    %c0_i32 = arith.constant 0 : i32
    %c0_i32_0 = arith.constant 0 : i32
    %c0_i32_1 = arith.constant 0 : i32
    return %arg0, %c0_i32, %c0_i32_0 : i32, i32, i32
  }
  func.func @transform_6(%arg0: i32, %arg1: i32) -> (i32, i32) {
    %c0_i32 = arith.constant 0 : i32
    %c0_i32_0 = arith.constant 0 : i32
    return %c0_i32, %arg1 : i32, i32
  }
}

</mosaic_0001>

<bundles_post_ra>
// kernel: net5_forward.1
= control target key start
LH: loop header
LB: loop body
LE: loop exit
PB: predicated region body
PF: predicated region fallthrough
CT: control target
= control target key end

     0   :  { %s2122_s0 = inlined_call_operand.vmem [shape: bf16[384,384], index: 0, kind: input, shape index: {}]   ;;  %s2123_s1 = inlined_call_operand.vmem [shape: f32[1,384], index: 1, kind: input, shape index: {}]   ;;  %s2124_s2 = inlined_call_operand.vmem [shape: f32[16,384], index: 2, kind: input, shape index: {}]   ;;  %s2125_s3 = inlined_call_operand.vmem [shape: f32[3,16,16], index: 3, kind: input, shape index: {}]   ;;  %s2126_s4 = inlined_call_operand.vmem [shape: f32[3,16,16], index: 4, kind: input, shape index: {}]   ;;  %s2127_s5 = inlined_call_operand.vmem [shape: f32[3,16,1], index: 5, kind: input, shape index: {}]   ;;  %s2128_s6 = inlined_call_operand.hbm [shape: f32[16,384], index: 6, kind: output, shape index: {}]  }
   0x1   :  { %2133 = sst [smem:[#allocation13_spill]] %s2122_s0 }
   0x2   :  { %11 = vsyncpa [#allocation5], 0 }
   0x3   :  { %13 = vsyncpa [#allocation5 + $0x1], 0  ;;  %s1764_s21 = smov 0   ;;  %s1766_s22 = smov 0  }
   0x4   :  { %s1768_s23 = smov 0   ;;  %s1770_s24 = smov 0  }
   0x5   :  { %s1772_s25 = smov 0   ;;  %s1774_s26 = smov 0  }
   0x6   :  { %s1776_s27 = smov 0   ;;  %s1778_s28 = smov 0  }
   0x7 LB: > { %2134 = sst [smem:[#allocation7_spill]] %s1702_s23  ;;  %s1210_s29 = sadd.s32 4294967295, %s1722_s28   ;;  %s1722_s28 = sphi %s1778_s28, %s19_s28   ;;  %s1718_s27 = sphi %s1776_s27, %s2149_s27   ;;  %s1714_s26 = sphi %s1774_s26, %s2148_s26   ;;  %s1710_s25 = sphi %s1772_s25, %s2147_s25   ;;  %s1706_s24 = sphi %s1770_s24, %s2146_s24   ;;  %s1702_s23 = sphi %s1768_s23, %s2145_s23   ;;  %s1698_s22 = sphi %s1766_s22, %s2151_s22   ;;  %s1694_s21 = sphi %s1764_s21, %s2150_s21  }
   0x8   : > { %2135 = sst [smem:[#allocation8_spill]] %s1714_s26  ;;  %s1211_s30 = sadd.s32 4294967294, %s1722_s28  }
   0x9   : > { %2136 = sst [smem:[#allocation9_spill]] %s1718_s27  ;;  %s28_s7 = sadd.s32 1, %s1714_s26 }
   0xa   : > { %s31_s8 = sadd.s32 1, %s1718_s27  ;;  %p29_p0 = scmp.ge.s32.totalorder %s28_s7, 3 }
   0xb   : > { %s38_s9 = sadd.s32 1, %s1702_s23  ;;  %p45_p1 = scmp.ne.s32.totalorder %s1702_s23, %s1698_s22 }
   0xc   : > { %p46_p2 = scmp.eq.s32.totalorder %s1722_s28, 0  ;;  %s2153_s7 = smov (%p29_p0, %s28_s7), 0 }
   0xd   : > { %2137 = sst [smem:[#allocation10_spill]] %s2153_s7  ;;  %s2155_s8 = smov (!%p29_p0, %s31_s8), %s1718_s27 }
   0xe   : > { %s35_s10 = ssub.s32 %s1714_s26, %s2153_s7  ;;  %p47_p3 = por %p46_p2, %p45_p1 }
   0xf   : > { %p33_p4 = scmp.ge.s32.totalorder %s2155_s8, 3  ;;  %p36_p5 = scmp.eq.s32.totalorder %s35_s10, 0 }
  0x10   : > { %p200_p6 = scmp.eq.s32.totalorder %s1210_s29, 8  ;;  %p205_p7 = scmp.ne.s32.totalorder %s1698_s22, %s1694_s21 }
  0x11   : > { %s2157_s8 = smov (%p33_p4, %s2155_s8), 0  ;;  %p206_p9 = scmp.eq.s32.totalorder %s1211_s30, 8 }
  0x12   : > { %2138 = sst [smem:[#allocation11_spill]] %s2157_s8  ;;  %p1824_p8 = por %p200_p6, %p45_p1 }
  0x13   : > { %s1822_s11 = scalar_select %p36_p5, %s1702_s23, %s38_s9  }
  0x14   : > { %p1828_p10 = por %p206_p9, %p205_p7  ;;  %p1213_p11 = scmp.ge.s32.totalorder %s1722_s28, 9 }
  0x15   : > { %2139 = sst [smem:[#allocation12_spill]] %s1822_s11 }
  0x16   : > { %225 = sbr.rel (%p1213_p11) target bundleno = 71 (0x47), region = 20 }
  0x1d   : > { %228 = sbr.rel (!%p47_p3) target bundleno = 71 (0x47), region = 24  ;;  %s230_s14 = sand.u32 (%p47_p3), 1, %s1702_s23  }
  0x1e   : > { %s1214_s15 = sshll.u32 (%p47_p3), %s1714_s26, 2  ;;  %s1550_s16 = smul.u32 (%p47_p3), 192, %s230_s14 }
  0x1f   : > { %s2142_s0 = sld [smem:[#allocation13_spill]] (%p47_p3) }
  0x20   : > { %s1845_s20 = scalar_lea.vmem (%p47_p3), [#allocation3], %s1550_s16 }
  0x25   : > { %s1838_s19 = scalar_lea.vmem %s2142_s0, %s1214_s15 }
  0x26   : > { %v250_v0 = vld [vmem:[%s1838_s19] sm:$0xf]  ;;  %v252_v1 = vld [vmem:[%s1838_s19 + $0xc] sm:$0xf]  ;;  %v254_v2 = vld [vmem:[%s1838_s19 + $0x18] sm:$0xf] }
  0x27   : > { %v256_v3 = vld [vmem:[%s1838_s19 + $0x24] sm:$0xf]  ;;  %v258_v4 = vld [vmem:[%s1838_s19 + $0x30] sm:$0xf]  ;;  %251 = vst [vmem:[%s1845_s20] sm:$0xf] %v250_v0 }
  0x28   : > { %253 = vst [vmem:[%s1845_s20 + $0x4] sm:$0xf] %v252_v1  ;;  %255 = vst [vmem:[%s1845_s20 + $0x8] sm:$0xf] %v254_v2  ;;  %v260_v5 = vld [vmem:[%s1838_s19 + $0x3c] sm:$0xf] }
  0x29   : > { %257 = vst [vmem:[%s1845_s20 + $0xc] sm:$0xf] %v256_v3  ;;  %259 = vst [vmem:[%s1845_s20 + $0x10] sm:$0xf] %v258_v4  ;;  %v262_v6 = vld [vmem:[%s1838_s19 + $0x48] sm:$0xf] }
  0x2a   : > { %v264_v7 = vld [vmem:[%s1838_s19 + $0x54] sm:$0xf]  ;;  %261 = vst [vmem:[%s1845_s20 + $0x14] sm:$0xf] %v260_v5  ;;  %263 = vst [vmem:[%s1845_s20 + $0x18] sm:$0xf] %v262_v6 }
  0x2b   : > { %265 = vst [vmem:[%s1845_s20 + $0x1c] sm:$0xf] %v264_v7  ;;  %v266_v8 = vld [vmem:[%s1838_s19 + $0x60] sm:$0xf]  ;;  %v268_v9 = vld [vmem:[%s1838_s19 + $0x6c] sm:$0xf] }
  0x2c   : > { %v270_v10 = vld [vmem:[%s1838_s19 + $0x78] sm:$0xf]  ;;  %267 = vst [vmem:[%s1845_s20 + $0x20] sm:$0xf] %v266_v8  ;;  %269 = vst [vmem:[%s1845_s20 + $0x24] sm:$0xf] %v268_v9 }
  0x2d   : > { %271 = vst [vmem:[%s1845_s20 + $0x28] sm:$0xf] %v270_v10  ;;  %v272_v11 = vld [vmem:[%s1838_s19 + $0x84] sm:$0xf]  ;;  %v274_v12 = vld [vmem:[%s1838_s19 + $0x90] sm:$0xf] }
  0x2e   : > { %v276_v13 = vld [vmem:[%s1838_s19 + $0x9c] sm:$0xf]  ;;  %273 = vst [vmem:[%s1845_s20 + $0x2c] sm:$0xf] %v272_v11  ;;  %275 = vst [vmem:[%s1845_s20 + $0x30] sm:$0xf] %v274_v12 }
  0x2f   : > { %277 = vst [vmem:[%s1845_s20 + $0x34] sm:$0xf] %v276_v13  ;;  %v278_v14 = vld [vmem:[%s1838_s19 + $0xa8] sm:$0xf]  ;;  %v280_v15 = vld [vmem:[%s1838_s19 + $0xb4] sm:$0xf] }
  0x30   : > { %v282_v16 = vld [vmem:[%s1838_s19 + $0xc0] sm:$0xf]  ;;  %279 = vst [vmem:[%s1845_s20 + $0x38] sm:$0xf] %v278_v14  ;;  %281 = vst [vmem:[%s1845_s20 + $0x3c] sm:$0xf] %v280_v15 }
  0x31   : > { %283 = vst [vmem:[%s1845_s20 + $0x40] sm:$0xf] %v282_v16  ;;  %v284_v17 = vld [vmem:[%s1838_s19 + $0xcc] sm:$0xf]  ;;  %v286_v18 = vld [vmem:[%s1838_s19 + $0xd8] sm:$0xf] }
  0x32   : > { %v288_v19 = vld [vmem:[%s1838_s19 + $0xe4] sm:$0xf]  ;;  %285 = vst [vmem:[%s1845_s20 + $0x44] sm:$0xf] %v284_v17  ;;  %287 = vst [vmem:[%s1845_s20 + $0x48] sm:$0xf] %v286_v18 }
  0x33   : > { %289 = vst [vmem:[%s1845_s20 + $0x4c] sm:$0xf] %v288_v19  ;;  %v290_v20 = vld [vmem:[%s1838_s19 + $0xf0] sm:$0xf]  ;;  %v292_v21 = vld [vmem:[%s1838_s19 + $0xfc] sm:$0xf] }
  0x34   : > { %v294_v22 = vld [vmem:[%s1838_s19 + $0x108] sm:$0xf]  ;;  %291 = vst [vmem:[%s1845_s20 + $0x50] sm:$0xf] %v290_v20  ;;  %293 = vst [vmem:[%s1845_s20 + $0x54] sm:$0xf] %v292_v21 }
  0x35   : > { %295 = vst [vmem:[%s1845_s20 + $0x58] sm:$0xf] %v294_v22  ;;  %v296_v23 = vld [vmem:[%s1838_s19 + $0x114] sm:$0xf]  ;;  %v298_v24 = vld [vmem:[%s1838_s19 + $0x120] sm:$0xf] }
  0x36   : > { %v300_v25 = vld [vmem:[%s1838_s19 + $0x12c] sm:$0xf]  ;;  %297 = vst [vmem:[%s1845_s20 + $0x5c] sm:$0xf] %v296_v23  ;;  %299 = vst [vmem:[%s1845_s20 + $0x60] sm:$0xf] %v298_v24 }
  0x37   : > { %301 = vst [vmem:[%s1845_s20 + $0x64] sm:$0xf] %v300_v25  ;;  %v302_v26 = vld [vmem:[%s1838_s19 + $0x138] sm:$0xf]  ;;  %v304_v27 = vld [vmem:[%s1838_s19 + $0x144] sm:$0xf] }
  0x38   : > { %v306_v28 = vld [vmem:[%s1838_s19 + $0x150] sm:$0xf]  ;;  %303 = vst [vmem:[%s1845_s20 + $0x68] sm:$0xf] %v302_v26  ;;  %305 = vst [vmem:[%s1845_s20 + $0x6c] sm:$0xf] %v304_v27 }
  0x39   : > { %307 = vst [vmem:[%s1845_s20 + $0x70] sm:$0xf] %v306_v28  ;;  %v308_v29 = vld [vmem:[%s1838_s19 + $0x15c] sm:$0xf]  ;;  %v310_v30 = vld [vmem:[%s1838_s19 + $0x168] sm:$0xf] }
  0x3a   : > { %v312_v31 = vld [vmem:[%s1838_s19 + $0x174] sm:$0xf]  ;;  %309 = vst [vmem:[%s1845_s20 + $0x74] sm:$0xf] %v308_v29  ;;  %311 = vst [vmem:[%s1845_s20 + $0x78] sm:$0xf] %v310_v30 }
  0x3b   : > { %313 = vst [vmem:[%s1845_s20 + $0x7c] sm:$0xf] %v312_v31  ;;  %v314_v32 = vld [vmem:[%s1838_s19 + $0x180] sm:$0xf]  ;;  %v316_v33 = vld [vmem:[%s1838_s19 + $0x18c] sm:$0xf] }
  0x3c   : > { %v318_v34 = vld [vmem:[%s1838_s19 + $0x198] sm:$0xf]  ;;  %315 = vst [vmem:[%s1845_s20 + $0x80] sm:$0xf] %v314_v32  ;;  %317 = vst [vmem:[%s1845_s20 + $0x84] sm:$0xf] %v316_v33 }
  0x3d   : > { %319 = vst [vmem:[%s1845_s20 + $0x88] sm:$0xf] %v318_v34  ;;  %v320_v35 = vld [vmem:[%s1838_s19 + $0x1a4] sm:$0xf]  ;;  %v322_v36 = vld [vmem:[%s1838_s19 + $0x1b0] sm:$0xf] }
  0x3e   : > { %v324_v37 = vld [vmem:[%s1838_s19 + $0x1bc] sm:$0xf]  ;;  %321 = vst [vmem:[%s1845_s20 + $0x8c] sm:$0xf] %v320_v35  ;;  %323 = vst [vmem:[%s1845_s20 + $0x90] sm:$0xf] %v322_v36 }
  0x3f   : > { %325 = vst [vmem:[%s1845_s20 + $0x94] sm:$0xf] %v324_v37  ;;  %v326_v38 = vld [vmem:[%s1838_s19 + $0x1c8] sm:$0xf]  ;;  %v328_v39 = vld [vmem:[%s1838_s19 + $0x1d4] sm:$0xf] }
  0x40   : > { %v330_v40 = vld [vmem:[%s1838_s19 + $0x1e0] sm:$0xf]  ;;  %327 = vst [vmem:[%s1845_s20 + $0x98] sm:$0xf] %v326_v38  ;;  %329 = vst [vmem:[%s1845_s20 + $0x9c] sm:$0xf] %v328_v39 }
  0x41   : > { %331 = vst [vmem:[%s1845_s20 + $0xa0] sm:$0xf] %v330_v40  ;;  %v332_v41 = vld [vmem:[%s1838_s19 + $0x1ec] sm:$0xf]  ;;  %v334_v42 = vld [vmem:[%s1838_s19 + $0x1f8] sm:$0xf] }
  0x42   : > { %v336_v43 = vld [vmem:[%s1838_s19 + $0x204] sm:$0xf]  ;;  %333 = vst [vmem:[%s1845_s20 + $0xa4] sm:$0xf] %v332_v41  ;;  %335 = vst [vmem:[%s1845_s20 + $0xa8] sm:$0xf] %v334_v42 }
  0x43   : > { %337 = vst [vmem:[%s1845_s20 + $0xac] sm:$0xf] %v336_v43  ;;  %v338_v44 = vld [vmem:[%s1838_s19 + $0x210] sm:$0xf]  ;;  %v340_v45 = vld [vmem:[%s1838_s19 + $0x21c] sm:$0xf] }
  0x44   : > { %v342_v46 = vld [vmem:[%s1838_s19 + $0x228] sm:$0xf]  ;;  %339 = vst [vmem:[%s1845_s20 + $0xb0] sm:$0xf] %v338_v44  ;;  %341 = vst [vmem:[%s1845_s20 + $0xb4] sm:$0xf] %v340_v45 }
  0x45   : > { %343 = vst [vmem:[%s1845_s20 + $0xb8] sm:$0xf] %v342_v46  ;;  %v344_v47 = vld [vmem:[%s1838_s19 + $0x234] sm:$0xf] }
  0x46   : > { %345 = vst [vmem:[%s1845_s20 + $0xbc] sm:$0xf] %v344_v47 }
  0x47 PF: > { %p1215_p12 = scmp.ge.s32.totalorder %s1722_s28, 1  ;;  %p493_p13 = scmp.lt.s32.totalorder %s1722_s28, 10 }
  0x49   : > { %p494_p0 = pnand %p1215_p12, %p493_p13 }
  0x4a   : > { %s1941_s29 = sand.u32 (!%p494_p0), 1, %s1698_s22   ;;  %p547_p1 = scmp.lt.s32.totalorder (!%p494_p0), %s1706_s24, 2 }
  0x4b   : > { %497 = sbr.rel (%p494_p0) target bundleno = 584 (0x248), region = 81  ;;  %s1216_s9 = sshll.u32 (!%p494_p0), %s1941_s29, 4 }
  0x4c   : > { %s1551_s30 = smul.u32 (!%p494_p0), 192, %s1941_s29  ;;  %p550_p2 = scmp.lt.s32.totalorder (!%p494_p0), %s1710_s25, 2 }
  0x4d   : > { %p565_p3 = scmp.eq.s32.totalorder (!%p494_p0), %s1710_s25, 0  ;;  %p566_p4 = scmp.eq.s32.totalorder (!%p494_p0), %s1706_s24, 0 }
  0x4e   : > { %s1972_s15 = scalar_lea.vmem (!%p494_p0), [#allocation3], %s1551_s30  ;;  %s1974_s16 = scalar_lea.vmem (!%p494_p0), [#allocation4], %s1216_s9 }
  0x4f   : > { %p567_p5 = pnand (!%p494_p0), %p566_p4, %p565_p3 }
  0x52   : > { %s1949_s10 = scalar_select %p547_p1, %s1706_s24, 2 }
  0x53   : > { %s551_s14 = scalar_select %p550_p2, %s1710_s25, 2 }
  0x54   : > { %570 = sbr.rel (%p567_p5) target bundleno = 91 (0x5b), region = 89  ;;  %v571_v48 = vld [vmem:[%s2124_s2] sm:$0xff] (!%p567_p5)  ;;  %v572_v49 = vld [vmem:[%s2124_s2 + $0x8] sm:$0xff] (!%p567_p5)  ;;  %v573_v50 = vld [vmem:[%s2124_s2 + $0x10] sm:$0xff] (!%p567_p5) }
  0x55   : > { %s1240_s18 = sshll.u32 %s551_s14, 4  ;;  %577 = vst [vmem:[#allocation2] sm:$0xff] (!%p567_p5), %v571_v48  ;;  %578 = vst [vmem:[#allocation2 + $0x8] sm:$0xff] (!%p567_p5), %v572_v49  ;;  %v574_v51 = vld [vmem:[%s2124_s2 + $0x18] sm:$0xff] (!%p567_p5)  ;;  %v575_v52 = vld [vmem:[%s2124_s2 + $0x20] sm:$0xff] (!%p567_p5) }
  0x56   : > { %s1960_s0 = scalar_lea.vmem %s2125_s3, %s1240_s18  ;;  %s1965_s27 = scalar_lea.vmem %s2126_s4, %s1240_s18  ;;  %579 = vst [vmem:[#allocation2 + $0x10] sm:$0xff] (!%p567_p5), %v573_v50  ;;  %v576_v53 = vld [vmem:[%s2124_s2 + $0x28] sm:$0xff] (!%p567_p5)  ;;  %580 = vst [vmem:[#allocation2 + $0x18] sm:$0xff] (!%p567_p5), %v574_v51 }
  0x57   : > { %s1970_s23 = scalar_lea.vmem %s2127_s5, %s1240_s18  ;;  %581 = vst [vmem:[#allocation2 + $0x20] sm:$0xff] (!%p567_p5), %v575_v52  ;;  %582 = vst [vmem:[#allocation2 + $0x28] sm:$0xff] (!%p567_p5), %v576_v53 }
  0x5b PF: > { %v1347_v54 = vld [vmem:[%s1972_s15 + $0x40] sm:$0xff]   ;;  %p583_p6 = scmp.lt.s32.totalorder %s1710_s25, 0  ;;  %s584_s17 = ssub.s32 0, %s1710_s25  ;;  %v1348_v57 = vld [vmem:[%s1972_s15 + $0x48] sm:$0xff]   ;;  %v1349_v60 = vld [vmem:[%s1972_s15 + $0x50] sm:$0xff]   ;;  %vm876_vm0 = vcmask 130048  }
  0x5c   : > { %v1245_v55 = vld [vmem:[%s1972_s15] sm:$0xff]   ;;  %1477 = vmatprep.subr.bf16.mxu0 %v1347_v54  ;;  %v1356_v58 = vld [vmem:[%s1972_s15 + $0x88] sm:$0xff]   ;;  %s1223_s19 = smin.u32 %s1710_s25, %s584_s17  ;;  %v1357_v61 = vld [vmem:[%s1972_s15 + $0x90] sm:$0xff]   ;;  %s1227_s9 = sshll.u32 %s1706_s24, 7  ;;  %v1724_v27 = vmov 0  }
  0x5d   : > { %v1355_v56 = vld [vmem:[%s1972_s15 + $0x80] sm:$0xff]   ;;  %1479 = vmatpush3.bf16.msra.mxu0 %v1245_v55  ;;  %s586_s20 = sand.u32 1, %s1223_s19   ;;  %v1340_v59 = vld [vmem:[%s1972_s15 + $0x8] sm:$0xff]   ;;  %v1341_v62 = vld [vmem:[%s1972_s15 + $0x10] sm:$0xff]   ;;  %s2038_s14 = sshra.s32 %s1227_s9, 7  ;;  %1627 = vset.pattern.permute.xlu0 %v1724_v27 }
  0x5e   : > { %1509 = vmatprep.subr.bf16.mxu1 %v1355_v56  ;;  %1481 = vmatprep.subr.bf16.mxu0 %v1348_v57  ;;  %s587_s7 = ssub.s32 0, %s586_s20  ;;  %v1350_v63 = vld [vmem:[%s1972_s15 + $0x58] sm:$0xff]   ;;  %v1351_v4 = vld [vmem:[%s1972_s15 + $0x60] sm:$0xff]   ;;  %v1352_v7 = vld [vmem:[%s1972_s15 + $0x68] sm:$0xff]   ;;  %s1064_s24 = scalar_lea.sflag [#allocation5], %s1941_s29 }
  0x5f   : > { %1511 = vmatpush3.bf16.msra.mxu1 %v1355_v56  ;;  %s2159_s7 = smov (!%p583_p6, %s587_s7), %s586_s20  ;;  %v1358_v0 = vld [vmem:[%s1972_s15 + $0x98] sm:$0xff]   ;;  %v1359_v5 = vld [vmem:[%s1972_s15 + $0xa0] sm:$0xff]   ;;  %v1360_v8 = vld [vmem:[%s1972_s15 + $0xa8] sm:$0xff]  }
  0x60   : > { %1513 = vmatprep.subr.bf16.mxu1 %v1356_v58  ;;  %s1224_s8 = sshll.u32 %s2159_s7, 4  ;;  %v1342_v1 = vld [vmem:[%s1972_s15 + $0x18] sm:$0xff]   ;;  %v1343_v6 = vld [vmem:[%s1972_s15 + $0x20] sm:$0xff]   ;;  %v1344_v9 = vld [vmem:[%s1972_s15 + $0x28] sm:$0xff]   ;;  %s2143_s7 = scalar_lea.vmem %s2123_s1, %s1949_s10 }
  0x61   : > { %1483 = vmatpush3.bf16.msra.mxu0 %v1340_v59  ;;  %s2008_s26 = sshra.s32 %s1224_s8, 3  ;;  %v1353_v10 = vld [vmem:[%s1972_s15 + $0x70] sm:$0xff]   ;;  %v1354_v13 = vld [vmem:[%s1972_s15 + $0x78] sm:$0xff]   ;;  %v874_v23 = vld [vmem:[%s1965_s27] sm:$0xff] }
  0x62   : > { %1485 = vmatprep.subr.bf16.mxu0 %v1349_v60  ;;  %s1243_s11 = smul.u32 24, %s2008_s26  ;;  %v1361_v11 = vld [vmem:[%s1972_s15 + $0xb0] sm:$0xff]   ;;  %v1362_v14 = vld [vmem:[%s1972_s15 + $0xb8] sm:$0xff]   ;;  %v875_v24 = vld [vmem:[%s1965_s27 + $0x8] sm:$0xff] }
  0x63   : > { %1515 = vmatpush3.bf16.msra.mxu1 %v1356_v58  ;;  %v1345_v12 = vld [vmem:[%s1972_s15 + $0x30] sm:$0xff]   ;;  %v1346_v15 = vld [vmem:[%s1972_s15 + $0x38] sm:$0xff]   ;;  %s601_s18 = smul.u32 3, %s2008_s26  ;;  %v872_v25 = vld [vmem:[%s1960_s0] sm:$0xff] }
  0x64   : > { %1517 = vmatprep.subr.bf16.mxu1 %v1357_v61  ;;  %s2014_s30 = scalar_lea.vmem [#allocation2], %s1243_s11  ;;  %v1039_v26 = vld [vmem:[%s1970_s23] sm:$0xff]  ;;  %v1040_v28 = vld [vmem:[%s1970_s23 + $0x8] sm:$0xff]  ;;  %s590_s23 = sadd.s32 1, %s1710_s25 }
  0x65   : > { %1487 = vmatpush3.bf16.msra.mxu0 %v1341_v62  ;;  %v605_v2 = vld [vmem:[%s2014_s30 + $0x8] sm:$0xff]  ;;  %v606_v3 = vld [vmem:[%s2014_s30 + $0x10] sm:$0xff]  ;;  %v604_v16 = vld [vmem:[%s2014_s30] sm:$0xff]  ;;  %s612_s15 = sadd.s32 %s2038_s14, %s601_s18  ;;  %1043 = vperm.xlu0 %1627, %v1039_v26   ;;  %s592_s8 = ssub.s32 0, %s590_s23 }
  0x66   : > { %1489 = vmatprep.subr.bf16.mxu0 %v1350_v63  ;;  %777 = vmatprep.mubr.f32.mxu0 %v605_v2  ;;  %v609_v17 = vld [vmem:[%s2014_s30 + $0x28] sm:$0xff]  ;;  %v608_v18 = vld [vmem:[%s2014_s30 + $0x20] sm:$0xff]  ;;  %v607_v19 = vld [vmem:[%s2014_s30 + $0x18] sm:$0xff]  ;;  %s1229_s17 = sshll.u32 %s612_s15, 3  ;;  %s1225_s26 = smin.u32 %s592_s8, %s590_s23 }
  0x67   : > { %1519 = vmatpush3.bf16.msra.mxu1 %v1357_v61  ;;  %1459 = vmatprep.mubr.f32.mxu1 %v606_v3  ;;  %s614_s19 = scalar_lea.vmem [#allocation2], %s1229_s17  ;;  %v1230_v38 = vld [vmem:[%s2143_s7] ss:$0 sm:$0xff]  ;;  %v873_v43 = vld [vmem:[%s1960_s0 + $0x8] sm:$0xff]  ;;  %s594_s11 = sand.u32 1, %s1225_s26  }
  0x68   : > { %1521 = vmatprep.subr.bf16.mxu1 %v1358_v0  ;;  %v615_v20 = vld [vmem:[%s614_s19] sm:$0xff]  ;;  %v616_v21 = vld [vmem:[%s614_s19 + $0x18] sm:$0xff]  ;;  %p591_p7 = scmp.lt.s32.totalorder %s590_s23, 0  ;;  %s595_s30 = ssub.s32 0, %s594_s11 }
  0x69   : > { %1491 = vmatpush3.bf16.msra.mxu0 %v1342_v1  ;;  %v1540_v22 = vpack.c.bf16 %v616_v21, %v615_v20  ;;  %1048 = vperm.xlu0 %1627, %v1040_v28   ;;  %s1076_s0 = sshll.u32 %s1974_s16, 4  ;;  %s2064_s25 = scalar_lea.hbm %s2128_s6, %s1227_s9  ;;  %s2066_s0 = int_to_ptr.vmem [resolvable:$true] %s1076_s0 }
  0x6a   : > { %1493 = vmatprep.subr.bf16.mxu0 %v1351_v4  ;;  %s2161_s30 = smov (!%p591_p7, %s595_s30), %s594_s11  ;;  %s1628_s7 = scalar_lea.vmem %s2066_s0, 256 }
  0x6b   : > { %1523 = vmatpush3.bf16.msra.mxu1 %v1358_v0  ;;  %s1226_s10 = sshll.u32 %s2161_s30, 4  ;;  %p1629_p9 = scmp.ne.s32.totalorder %s2066_s0, %s1628_s7 }
  0x6c   : > { %1525 = vmatprep.subr.bf16.mxu1 %v1359_v5  ;;  %s1053_s18 = sshra.s32 %s1226_s10, 3  ;;  %s1725_s9 = smov [#allocation4]  }
  0x6d   : > { %1495 = vmatpush3.bf16.msra.mxu0 %v1343_v6  ;;  %s1055_s15 = smul.u32 3, %s1053_s18  ;;  %p1630_p11 = pnand %p1629_p9, %p1824_p8 }
  0x6e   : > { %1497 = vmatprep.subr.bf16.mxu0 %v1352_v7  ;;  %s1632_s23 = sshll.u32 %s1725_s9, 4  ;;  %s1633_s23 = int_to_ptr.vmem [resolvable:$false] %s1632_s23 }
  0x6f   : > { %1527 = vmatpush3.bf16.msra.mxu1 %v1359_v5  ;;  %s1056_s17 = sadd.s32 %s1055_s15, %s2038_s14  ;;  %p1631_p12 = pneg %p1630_p11 }
  0x70   : > { %1529 = vmatprep.subr.bf16.mxu1 %v1360_v8  ;;  %s1235_s19 = sshll.u32 %s1056_s17, 3  ;;  %s1634_s8 = scalar_lea.vmem %s1633_s23, 512 }
  0x71   : > { %1499 = vmatpush3.bf16.msra.mxu0 %v1344_v9  ;;  %s1058_s14 = scalar_lea.vmem [#allocation2], %s1235_s19  ;;  %p1635_p13 = scmp.lt.s32.totalorder %s2066_s0, %s1633_s23 }
  0x72   : > { %1501 = vmatprep.subr.bf16.mxu0 %v1353_v10  ;;  %p1636_p0 = scmp.lt.s32.totalorder %s1634_s8, %s1628_s7 }
  0x73   : > { %1531 = vmatpush3.bf16.msra.mxu1 %v1360_v8 }
  0x74   : > { %1533 = vmatprep.subr.bf16.mxu1 %v1361_v11  ;;  %p1637_p1 = por %p1636_p0, %p1635_p13 }
  0x75   : > { %1503 = vmatpush3.bf16.msra.mxu0 %v1345_v12 }
  0x76   : > { %1505 = vmatprep.subr.bf16.mxu0 %v1354_v13  ;;  %p1638_p2 = pnand %p1637_p1, %p1631_p12 }
  0x77   : > { %1535 = vmatpush3.bf16.msra.mxu1 %v1361_v11 }
  0x78   : > { %1537 = vmatprep.subr.bf16.mxu1 %v1362_v14 }
  0x79   : > { %1507 = vmatpush3.bf16.msra.mxu0 %v1346_v15 }
  0x7b   : > { %1539 = vmatpush3.bf16.msra.mxu1 %v1362_v14 }
  0x7c   : > { %778 = vmatmul.mubr.f32.vlgmr.msra.gmra.mrb[0].mxu0 %v604_v16  ;;  %1541 = vmatprep.subr.bf16.mxu1 %v1540_v22 }
  0x7d   : > { %782 = vmatprep.mubr.f32.mxu0 %v608_v18 }
  0x7e   : > { %1460 = vmatmul.mubr.f32.vlgmr.msra.gmra.mrb[0].mxu1 %v609_v17 }
  0x7f   : > { %1543 = vmatpush3.bf16.msra.mxu1 %v1540_v22  ;;  %1466 = vmatprep.mubr.msk.f32.mxu1 %vm876_vm0, %v874_v23 }
  0x80   : > { %783 = vmatmul.mubr.f32.gmra.mrb[2].mxu0 %v607_v19 }
  0x82   : > { %1467 = vmatmul.mubr.msk.f32.vlgmr.msra.gmra.mrb[2].mxu1 %vm876_vm0, %v875_v24 }
  0x83   : > { %1473 = vmatprep.mubr.msk.f32.mxu1 %vm876_vm0, %v872_v25 }
  0xe4   : > { %v1044_v44 = vpop.permute.xlu0 %1043 }
  0xe8   : > { %v1049_v45 = vpop.permute.xlu0 %1048 }
 0x14f   : > { %v1395_v29 = vpop.f32.mrb[0].mxu0 }
 0x150   : > { %v1396_v31 = vpop.f32.mrb[1].mxu0 }
 0x151   : > { %v1461_v30 = vpop.f32.mrb[0].mxu1  ;;  %v1397_v33 = vadd.f32 %v1396_v31, %v1395_v29 }
 0x152   : > { %v854_v32 = vpop.f32.mrb[1].mxu1 }
 0x153   : > { %v855_v34 = vadd.f32 %v1397_v33, %v854_v32  ;;  %v1398_v35 = vpop.f32.mrb[2].mxu0 }
 0x154   : > { %v1399_v36 = vpop.f32.mrb[3].mxu0 }
 0x155   : > { %v1400_v37 = vadd.f32 %v1399_v36, %v1398_v35  ;;  %v870_v40 = vmul.f32 %v1230_v38, %v855_v34 }
 0x157   : > { %v860_v39 = vadd.f32 %v1461_v30, %v1400_v37 }
 0x159   : > { %v871_v41 = vmul.f32 %v1230_v38, %v860_v39 }
 0x15b   : > { %v1544_v42 = vpack.c.bf16 %v871_v41, %v870_v40 }
 0x15d   : > { %1545 = vmatprep.subr.bf16.mxu1 %v1544_v42 }
 0x15e   : > { %1547 = vmatpush3.bf16.msra.mxu1 %v1544_v42 }
 0x161   : > { %1474 = vmatmul.mubr.msk.f32.vlgmr.msra.gmra.mrb[2].mxu1 %vm876_vm0, %v873_v43 }
 0x234   : > { %v1475_v46 = vpop.f32.mrb[2].mxu1 }
 0x235   : > { %v1052_v47 = vadd.f32 %v1475_v46, %v1049_v45  ;;  %v1030_v48 = vpop.f32.mrb[3].mxu1 }
 0x236   : > { %v1051_v49 = vadd.f32 %v1044_v44, %v1030_v48 }
 0x237   : > { %1060 = vst [vmem:[%s1058_s14 + $0x18] sm:$0xff] %v1052_v47  ;;  %1062 = vst [vmem:[%s1974_s16 + $0x8] sm:$0xff] %v1052_v47 }
 0x238   : > { %1059 = vst [vmem:[%s1058_s14] sm:$0xff] %v1051_v49  ;;  %1061 = vst [vmem:[%s1974_s16] sm:$0xff] %v1051_v49 }
 0x239   : > { %1641 = shalt.err (!%p1638_p2)
}
 0x23a   : > { %s1642_s16 = scalar_lea.hbm %s2064_s25, 256  ;;  %s1646_s30 = scalar_lea.hbm %s2128_s6, 768 }
 0x23b   : > { %p1643_p3 = scmp.ne.s32.totalorder %s2064_s25, %s1642_s16  ;;  %p1647_p6 = scmp.lt.u32.totalorder %s2064_s25, %s2128_s6 }
 0x23c   : > { %p1648_p7 = scmp.lt.u32.totalorder %s1646_s30, %s1642_s16  ;;  %p1650_p11 = scmp.lt.u32.totalorder %s1642_s16, %s2064_s25 }
 0x23d   : > { %p1644_p4 = pnand %p1643_p3, %p1824_p8 }
 0x23e   : > { %p1649_p9 = por %p1648_p7, %p1647_p6 }
 0x23f   : > { %p1645_p5 = pneg %p1644_p4 }
 0x240   : > { %p1651_p12 = por %p1650_p11, %p1649_p9 }
 0x242   : > { %p1652_p13 = pnand %p1651_p12, %p1645_p5 }
 0x244   : > { %1655 = shalt.err (!%p1652_p13)
}
 0x245   : > { %s1726_s15 = smov 128   ;;  %s1727_s17 = smov 384  }
 0x246   : > { %s1728_s19 = smov 8  }
 0x247   : > { %1552 = dma.vmem_to_hbm [thread:$0]  (%p1824_p8), %s2066_s0, 256, %s2064_s25, %s1064_s24, %s1726_s15, %s1727_s17, %s1728_s19  }
 0x248 PF: > { %p1558_p0 = scmp.ge.s32.totalorder %s1722_s28, 2  ;;  %s1091_s27 = sand.u32 1, %s1694_s21  }
 0x249   : > { %s1092_s20 = scalar_lea.sflag [#allocation5], %s1091_s27 }
 0x24a   : > { %p1555_p1 = pnand %p1558_p0, %p1828_p10 }
 0x24c   : > { %1689 = dma.done.wait (!%p1555_p1), %s1092_s20, 256  }
 0x24d   : > { %1691 = vsyncadd (!%p1555_p1), %s1092_s20, 4294967040  ;;  %s19_s28 = sadd.s32 1, %s1722_s28   ;;  %s2144_s14 = sld [smem:[#allocation7_spill]] }
 0x24e   : > { %p16_p2 = scmp.ge.s32.totalorder %s19_s28, 11   ;;  %s2145_s23 = sld [smem:[#allocation12_spill]] }
 0x24f   : > { %s2146_s24 = sld [smem:[#allocation8_spill]]  ;;  %s2147_s25 = sld [smem:[#allocation9_spill]] }
 0x250   : > { %s2148_s26 = sld [smem:[#allocation10_spill]]  ;;  %s2149_s27 = sld [smem:[#allocation11_spill]] }
 0x251   : > { %s2150_s21 = smov %s1698_s22  ;;  %18 = sbr.rel (!%p16_p2) target bundleno = 7 (0x7), region = 144 }
 0x253   : > { %s2151_s22 = smov %s2144_s14 }
 0x258   :  { %1097 = vsyncpa [#allocation5], 1 }
 0x259   :  { %1099 = vsyncpa [#allocation5 + $0x1], 1 }

</bundles_post_ra>
